<compile_context>
chip_gen: v5e
topology: v5e:2x2
jax: 0.10.0
libtpu: 0.0.40
codegen_flags: <defaults>
</compile_context>

<pallas_src>
import functools

import jax
import jax.numpy as jnp
from jax import lax
from jax.experimental import pallas as pl
from jax.experimental.pallas import tpu as pltpu


NEG_INF = -1e30  # large finite negative; avoids (-inf)-(-inf) NaN paths


def _round_up(x, m):
    return (x + m - 1) // m * m


def _max_seq_tile():
    """256 for 256-wide-MXU chips (v6e / v7x), 128 for v5e and older."""
    try:
        kind = jax.devices()[0].device_kind.lower()
    except Exception:
        return 256
    if any(v in kind for v in ("v2", "v3", "v4", "v5")):
        return 128
    return 256


def _pick_seq_tile(T, tmax):
    """Sequence tile (tq == tk): MXU-friendly, modest padding, <= tmax."""
    if T <= tmax:
        return _round_up(T, 8)
    for c in (512, 256, 128):
        if c <= tmax and T % c == 0:
            return c
    return min(tmax, 256)


# ---------------------------------------------------------------------------
# Fused kernel: QKV projection + flash-style causal attention, one grid step
# per live (q_tile, kv_tile) pair of the causal triangle.
#
#   qi_tab / ki_tab : SMEM scalar-prefetch lookup tables (step -> block index)
#   xq_ref / xkv_ref: (t, C) bf16 x tiles (same array, different index maps)
#   wq_ref          : (C, Hp)  bf16, C**-0.5 already folded in
#   wkv_ref         : (C, 2Hp) bf16, [Wk | Wv]
#   o_ref           : (t, Hp)  bf16 output tile
#   scratch: q_sc (t,Hp) bf16, m_sc/l_sc (t,1) f32, acc_sc (t,Hp) f32
# ---------------------------------------------------------------------------
def _fused_attn_kernel(qi_tab, ki_tab, xq_ref, xkv_ref, wq_ref, wkv_ref, o_ref,
                       q_sc, m_sc, l_sc, acc_sc, *, t, hp):
    s_idx = pl.program_id(1)
    qi = qi_tab[s_idx]
    ki = ki_tab[s_idx]

    # First kv step of a query row: project Q (scale folded into wq) and
    # reset the online-softmax state.
    @pl.when(ki == 0)
    def _init():
        q_sc[...] = jnp.dot(
            xq_ref[...], wq_ref[...], preferred_element_type=jnp.float32
        ).astype(q_sc.dtype)
        m_sc[...] = jnp.full_like(m_sc, NEG_INF)
        l_sc[...] = jnp.zeros_like(l_sc)
        acc_sc[...] = jnp.zeros_like(acc_sc)

    # Project K and V for this kv tile with a single MXU call.
    kv = jnp.dot(xkv_ref[...], wkv_ref[...], preferred_element_type=jnp.float32)
    k = kv[:, :hp].astype(jnp.bfloat16)
    v = kv[:, hp:].astype(jnp.bfloat16)

    # Scores: contract the head axes directly (no explicit k transpose).
    s = lax.dot_general(
        q_sc[...], k, (((1,), (1,)), ((), ())),
        preferred_element_type=jnp.float32)               # (t, t) f32

    # Causal mask is only active on the diagonal block (ki == qi); blocks with
    # ki > qi never appear in the triangular grid.  Padded key columns only
    # ever land in the diagonal block of the last tile, where this mask also
    # removes them for all valid query rows.
    row = lax.broadcasted_iota(jnp.int32, (t, t), 0)
    col = lax.broadcasted_iota(jnp.int32, (t, t), 1)
    visible = jnp.logical_or(ki < qi, col <= row)
    s = jnp.where(visible, s, NEG_INF)

    # Online-softmax update (f32 statistics).
    m_prev = m_sc[...]
    m_new = jnp.maximum(m_prev, jnp.max(s, axis=-1, keepdims=True))
    alpha = jnp.exp(m_prev - m_new)
    p = jnp.exp(s - m_new)
    l_sc[...] = alpha * l_sc[...] + jnp.sum(p, axis=-1, keepdims=True)
    acc_sc[...] = alpha * acc_sc[...] + jnp.dot(
        p.astype(v.dtype), v, preferred_element_type=jnp.float32)
    m_sc[...] = m_new

    # The diagonal block is the last kv step for this query row -> finalize.
    @pl.when(ki == qi)
    def _finalize():
        inv_l = pl.reciprocal(l_sc[...], approx=True)     # EUP vrcp, ~free
        o_ref[...] = (acc_sc[...] * inv_l).astype(o_ref.dtype)


# ---------------------------------------------------------------------------
# Wrapper
# ---------------------------------------------------------------------------
def scaled_attention(x, wq, wk, wv):
    """x: (B, T, C) float32; wq/wk/wv: (H, C) PyTorch nn.Linear weights (no bias)."""
    B, T, C = x.shape
    H = wq.shape[0]
    orig_dtype = x.dtype

    Hp = _round_up(H, 128)                 # lane-dense head dim (128-multiple)
    t = _pick_seq_tile(T, _max_seq_tile())
    Tp = _round_up(T, t)
    num_t = Tp // t

    # Fused, padded weights.  In a real model these would be prepared once
    # (outside the per-call path); under jit they constant-fold anyway.
    scale = C ** (-0.5)
    w_q = (jnp.zeros((C, Hp), jnp.float32)
           .at[:, :H].set(wq.T * scale)
           .astype(jnp.bfloat16))                                   # (C, Hp)
    w_kv = (jnp.zeros((C, 2 * Hp), jnp.float32)
            .at[:, :H].set(wk.T)
            .at[:, Hp:Hp + H].set(wv.T)
            .astype(jnp.bfloat16))                                  # (C, 2Hp)

    # Pad the sequence only when needed (padding rows are zero -> zero K rows,
    # masked out by the diagonal causal mask for all valid queries).
    if Tp == T:
        x_p = x.astype(jnp.bfloat16)
    else:
        x_p = (jnp.zeros((B, Tp, C), jnp.bfloat16)
               .at[:, :T, :].set(x.astype(jnp.bfloat16)))

    # Flatten the causal triangle into a 1-D step axis: for each qi, ki runs
    # 0..qi.  Fully-masked (ki > qi) blocks simply never exist.
    qi_list, ki_list = [], []
    for q_blk in range(num_t):
        for k_blk in range(q_blk + 1):
            qi_list.append(q_blk)
            ki_list.append(k_blk)
    num_steps = len(qi_list)
    qi_tab = jnp.asarray(qi_list, dtype=jnp.int32)
    ki_tab = jnp.asarray(ki_list, dtype=jnp.int32)

    kernel = functools.partial(_fused_attn_kernel, t=t, hp=Hp)

    out_padded = pl.pallas_call(
        kernel,
        out_shape=jax.ShapeDtypeStruct((B, Tp, Hp), jnp.bfloat16),
        grid_spec=pltpu.PrefetchScalarGridSpec(
            num_scalar_prefetch=2,
            grid=(B, num_steps),               # batch parallel, steps arbitrary
            in_specs=[
                # q-side x tile: block index only changes when qi changes.
                pl.BlockSpec((pl.Squeezed(), t, C),
                             lambda b, s, qt, kt: (b, qt[s], 0)),
                # kv-side x tile: one narrow (t, C) stream per live kv step.
                pl.BlockSpec((pl.Squeezed(), t, C),
                             lambda b, s, qt, kt: (b, kt[s], 0)),
                # Weights: constant block index -> DMA'd once, VMEM-resident.
                pl.BlockSpec((C, Hp), lambda b, s, qt, kt: (0, 0)),
                pl.BlockSpec((C, 2 * Hp), lambda b, s, qt, kt: (0, 0)),
            ],
            out_specs=pl.BlockSpec((pl.Squeezed(), t, Hp),
                                   lambda b, s, qt, kt: (b, qt[s], 0)),
            scratch_shapes=[
                pltpu.VMEM((t, Hp), jnp.bfloat16),  # projected Q (per q row)
                pltpu.VMEM((t, 1), jnp.float32),    # running max  m
                pltpu.VMEM((t, 1), jnp.float32),    # running sum  l
                pltpu.VMEM((t, Hp), jnp.float32),   # f32 output accumulator
            ],
        ),
        compiler_params=pltpu.CompilerParams(
            dimension_semantics=("parallel", "arbitrary"),
            # Per-step footprint is well under 1 MiB even at t=256; 32 MiB is a
            # comfortable ceiling on v5e/v6e (128 MiB) and v7x (64 MiB).
            vmem_limit_bytes=32 * 1024 * 1024,
        ),
    )(qi_tab, ki_tab, x_p, x_p, w_q, w_kv)

    return out_padded[:, :T, :H].astype(orig_dtype)


def scaled_attention_ref(x, wq, wk, wv):
    """Pure-JAX f32 reference matching the PyTorch forward (eval mode)."""
    B, T, C = x.shape
    q = x @ wq.T
    k = x @ wk.T
    v = x @ wv.T
    wei = (q @ jnp.swapaxes(k, -2, -1)) * (C ** -0.5)
    mask = jnp.tril(jnp.ones((T, T), dtype=bool))
    wei = jnp.where(mask, wei, -jnp.inf)
    wei = jax.nn.softmax(wei, axis=-1)
    return wei @ v


if __name__ == "__main__":
    # small shapes: batch=2, seq/block_size=8, emb_size=32, head_size=16
    B, T, C, H = 2, 8, 32, 16

    key = jax.random.PRNGKey(0)
    kx, kq, kk, kv_key = jax.random.split(key, 4)

    x = jax.random.normal(kx, (B, T, C), dtype=jnp.float32)
    # nn.Linear(emb_size, head_size, bias=False) weight shape: (head_size, emb_size)
    w_scale = 1.0 / jnp.sqrt(C)
    wq = jax.random.uniform(kq, (H, C), minval=-w_scale, maxval=w_scale, dtype=jnp.float32)
    wk = jax.random.uniform(kk, (H, C), minval=-w_scale, maxval=w_scale, dtype=jnp.float32)
    wv = jax.random.uniform(kv_key, (H, C), minval=-w_scale, maxval=w_scale, dtype=jnp.float32)

    out = jax.block_until_ready(scaled_attention(x, wq, wk, wv))
    ref = scaled_attention_ref(x, wq, wk, wv)
    assert out.shape == (B, T, H)
    # bf16 MXU inputs / bf16 output (f32 accumulation) -> loosened tolerance.
    assert jnp.allclose(out, ref, atol=3e-2, rtol=3e-2), "mismatch vs reference (small)"

    # Exercise the multi-tile triangular-grid path (still a small problem).
    T2 = 384
    x2 = jax.random.normal(kx, (B, T2, C), dtype=jnp.float32)
    out2 = jax.block_until_ready(scaled_attention(x2, wq, wk, wv))
    ref2 = scaled_attention_ref(x2, wq, wk, wv)
    assert out2.shape == (B, T2, H)
    assert jnp.allclose(out2, ref2, atol=3e-2, rtol=3e-2), "mismatch vs reference (multi-tile)"

    print("KERNEL_OK")
</pallas_src>

<mosaic_0001>
module attributes {stable_mosaic.version = 11 : i64} {
  func.func @_fused_attn_kernel(%arg0: i32, %arg1: i32, %arg2: memref<1xi32, #tpu.memory_space<smem>>, %arg3: memref<1xi32, #tpu.memory_space<smem>>, %arg4: memref<1x8x32xbf16, #tpu.memory_space<vmem>>, %arg5: memref<1x8x32xbf16, #tpu.memory_space<vmem>>, %arg6: memref<32x128xbf16, #tpu.memory_space<vmem>>, %arg7: memref<32x256xbf16, #tpu.memory_space<vmem>>, %arg8: memref<1x8x128xbf16, #tpu.memory_space<vmem>>, %arg9: memref<8x128xbf16, #tpu.memory_space<vmem>>, %arg10: memref<8x1xf32, #tpu.memory_space<vmem>>, %arg11: memref<8x1xf32, #tpu.memory_space<vmem>>, %arg12: memref<8x128xf32, #tpu.memory_space<vmem>>) attributes {dimension_semantics = [#tpu.dimension_semantics<parallel>, #tpu.dimension_semantics<arbitrary>], iteration_bounds = array<i64: 2, 1>, scalar_prefetch = 2 : i64, scratch_operands = 4 : i64, tpu.core_type = #tpu.core_type<tc>, window_params = [{transform_indices = @transform_0, window_bounds = array<i64: 1, 8, 32>}, {transform_indices = @transform_1, window_bounds = array<i64: 1, 8, 32>}, {pipeline_mode = #tpu.pipeline_mode<synchronous>, transform_indices = @transform_2, window_bounds = array<i64: 32, 128>}, {pipeline_mode = #tpu.pipeline_mode<synchronous>, transform_indices = @transform_3, window_bounds = array<i64: 32, 256>}, {transform_indices = @transform_4, window_bounds = array<i64: 1, 8, 128>}]} {
    %0 = arith.index_cast %arg1 : i32 to index
    %1 = memref.load %arg2[%0] : memref<1xi32, #tpu.memory_space<smem>>
    %2 = arith.index_cast %arg1 : i32 to index
    %3 = memref.load %arg3[%2] : memref<1xi32, #tpu.memory_space<smem>>
    %c0_i32 = arith.constant 0 : i32
    %4 = arith.cmpi eq, %3, %c0_i32 : i32
    %5 = arith.extui %4 : i1 to i32
    %c0_i32_0 = arith.constant 0 : i32
    %6 = arith.cmpi ne, %5, %c0_i32_0 : i32
    scf.if %6 {
      %c0_25 = arith.constant 0 : index
      %c0_26 = arith.constant 0 : index
      %c0_27 = arith.constant 0 : index
      %51 = vector.load %arg4[%c0_25, %c0_26, %c0_27] : memref<1x8x32xbf16, #tpu.memory_space<vmem>>, vector<1x8x32xbf16>
      %52 = vector.shape_cast %51 : vector<1x8x32xbf16> to vector<8x32xbf16>
      %c0_28 = arith.constant 0 : index
      %c0_29 = arith.constant 0 : index
      %53 = vector.load %arg6[%c0_28, %c0_29] : memref<32x128xbf16, #tpu.memory_space<vmem>>, vector<32x128xbf16>
      %cst_30 = arith.constant dense<0.000000e+00> : vector<8x128xf32>
      %54 = tpu.matmul %52, %53, %cst_30 {dimension_numbers = #tpu.dot_dimension_numbers<[1], [0], [0], [1], [0, 0, 1, 1], [], []>} : vector<8x32xbf16>, vector<32x128xbf16>, vector<8x128xf32> -> vector<8x128xf32>
      %55 = arith.truncf %54 : vector<8x128xf32> to vector<8x128xbf16>
      %c0_31 = arith.constant 0 : index
      %c0_32 = arith.constant 0 : index
      %56 = vector.load %arg9[%c0_31, %c0_32] : memref<8x128xbf16, #tpu.memory_space<vmem>>, vector<8x128xbf16>
      tpu.vector_store %arg9[%c0_31, %c0_32], %55 {strides = array<i32>} : memref<8x128xbf16, #tpu.memory_space<vmem>>, vector<8x128xbf16>,
      %cst_33 = arith.constant -1.000000e+30 : f32
      %57 = vector.broadcast %cst_33 : f32 to vector<8x1xf32>
      %c0_34 = arith.constant 0 : index
      %c0_35 = arith.constant 0 : index
      %58 = vector.load %arg10[%c0_34, %c0_35] : memref<8x1xf32, #tpu.memory_space<vmem>>, vector<8x1xf32>
      tpu.vector_store %arg10[%c0_34, %c0_35], %57 {strides = array<i32>} : memref<8x1xf32, #tpu.memory_space<vmem>>, vector<8x1xf32>,
      %cst_36 = arith.constant 0.000000e+00 : f32
      %59 = vector.broadcast %cst_36 : f32 to vector<8x1xf32>
      %c0_37 = arith.constant 0 : index
      %c0_38 = arith.constant 0 : index
      %60 = vector.load %arg11[%c0_37, %c0_38] : memref<8x1xf32, #tpu.memory_space<vmem>>, vector<8x1xf32>
      tpu.vector_store %arg11[%c0_37, %c0_38], %59 {strides = array<i32>} : memref<8x1xf32, #tpu.memory_space<vmem>>, vector<8x1xf32>,
      %cst_39 = arith.constant 0.000000e+00 : f32
      %61 = vector.broadcast %cst_39 : f32 to vector<8x128xf32>
      %c0_40 = arith.constant 0 : index
      %c0_41 = arith.constant 0 : index
      %62 = vector.load %arg12[%c0_40, %c0_41] : memref<8x128xf32, #tpu.memory_space<vmem>>, vector<8x128xf32>
      tpu.vector_store %arg12[%c0_40, %c0_41], %61 {strides = array<i32>} : memref<8x128xf32, #tpu.memory_space<vmem>>, vector<8x128xf32>,
    } else {
    }
    %c0 = arith.constant 0 : index
    %c0_1 = arith.constant 0 : index
    %c0_2 = arith.constant 0 : index
    %7 = vector.load %arg5[%c0, %c0_1, %c0_2] : memref<1x8x32xbf16, #tpu.memory_space<vmem>>, vector<1x8x32xbf16>
    %8 = vector.shape_cast %7 : vector<1x8x32xbf16> to vector<8x32xbf16>
    %c0_3 = arith.constant 0 : index
    %c0_4 = arith.constant 0 : index
    %9 = vector.load %arg7[%c0_3, %c0_4] : memref<32x256xbf16, #tpu.memory_space<vmem>>, vector<32x256xbf16>
    %cst = arith.constant dense<0.000000e+00> : vector<8x256xf32>
    %10 = tpu.matmul %8, %9, %cst {dimension_numbers = #tpu.dot_dimension_numbers<[1], [0], [0], [1], [0, 0, 1, 1], [], []>} : vector<8x32xbf16>, vector<32x256xbf16>, vector<8x256xf32> -> vector<8x256xf32>
    %11 = vector.extract_strided_slice %10 {offsets = [0, 0], sizes = [8, 128], strides = [1, 1]} : vector<8x256xf32> to vector<8x128xf32>
    %12 = arith.truncf %11 : vector<8x128xf32> to vector<8x128xbf16>
    %13 = vector.extract_strided_slice %10 {offsets = [0, 128], sizes = [8, 128], strides = [1, 1]} : vector<8x256xf32> to vector<8x128xf32>
    %14 = arith.truncf %13 : vector<8x128xf32> to vector<8x128xbf16>
    %c0_5 = arith.constant 0 : index
    %c0_6 = arith.constant 0 : index
    %15 = vector.load %arg9[%c0_5, %c0_6] : memref<8x128xbf16, #tpu.memory_space<vmem>>, vector<8x128xbf16>
    %cst_7 = arith.constant dense<0.000000e+00> : vector<8x8xf32>
    %16 = tpu.matmul %15, %12, %cst_7 {dimension_numbers = #tpu.dot_dimension_numbers<[1], [1], [0], [0], [0, 0, 1, 0], [], []>} : vector<8x128xbf16>, vector<8x128xbf16>, vector<8x8xf32> -> vector<8x8xf32>
    %17 = tpu.iota {dimensions = array<i32: 0>} : vector<8x8xi32>
    %18 = tpu.iota {dimensions = array<i32: 1>} : vector<8x8xi32>
    %19 = arith.cmpi slt, %3, %1 : i32
    %20 = arith.cmpi sle, %18, %17 : vector<8x8xi32>
    %21 = vector.broadcast %19 : i1 to vector<8x8xi1>
    %22 = arith.ori %21, %20 : vector<8x8xi1>
    %cst_8 = arith.constant -1.000000e+30 : f32
    %23 = vector.broadcast %cst_8 : f32 to vector<8x8xf32>
    %24 = arith.select %22, %16, %23 : vector<8x8xi1>, vector<8x8xf32>
    %c0_9 = arith.constant 0 : index
    %c0_10 = arith.constant 0 : index
    %25 = vector.load %arg10[%c0_9, %c0_10] : memref<8x1xf32, #tpu.memory_space<vmem>>, vector<8x1xf32>
    %cst_11 = arith.constant dense<0xFF800000> : vector<8xf32>
    %26 = vector.multi_reduction <maximumf>, %24, %cst_11 [1] : vector<8x8xf32> to vector<8xf32>
    %27 = vector.shape_cast %26 : vector<8xf32> to vector<8x1xf32>
    %28 = arith.maximumf %25, %27 : vector<8x1xf32>
    %29 = arith.subf %25, %28 : vector<8x1xf32>
    %30 = math.exp %29 : vector<8x1xf32>
    %31 = vector.broadcast %28 : vector<8x1xf32> to vector<8x8xf32>
    %32 = arith.subf %24, %31 : vector<8x8xf32>
    %33 = math.exp %32 : vector<8x8xf32>
    %c0_12 = arith.constant 0 : index
    %c0_13 = arith.constant 0 : index
    %34 = vector.load %arg11[%c0_12, %c0_13] : memref<8x1xf32, #tpu.memory_space<vmem>>, vector<8x1xf32>
    %35 = arith.mulf %30, %34 : vector<8x1xf32>
    %cst_14 = arith.constant dense<0.000000e+00> : vector<8xf32>
    %36 = vector.multi_reduction <add>, %33, %cst_14 [1] : vector<8x8xf32> to vector<8xf32>
    %37 = vector.shape_cast %36 : vector<8xf32> to vector<8x1xf32>
    %38 = arith.addf %35, %37 : vector<8x1xf32>
    %c0_15 = arith.constant 0 : index
    %c0_16 = arith.constant 0 : index
    %39 = vector.load %arg11[%c0_15, %c0_16] : memref<8x1xf32, #tpu.memory_space<vmem>>, vector<8x1xf32>
    tpu.vector_store %arg11[%c0_15, %c0_16], %38 {strides = array<i32>} : memref<8x1xf32, #tpu.memory_space<vmem>>, vector<8x1xf32>,
    %c0_17 = arith.constant 0 : index
    %c0_18 = arith.constant 0 : index
    %40 = vector.load %arg12[%c0_17, %c0_18] : memref<8x128xf32, #tpu.memory_space<vmem>>, vector<8x128xf32>
    %41 = vector.broadcast %30 : vector<8x1xf32> to vector<8x128xf32>
    %42 = arith.mulf %41, %40 : vector<8x128xf32>
    %43 = arith.truncf %33 : vector<8x8xf32> to vector<8x8xbf16>
    %cst_19 = arith.constant dense<0.000000e+00> : vector<8x128xf32>
    %44 = tpu.matmul %43, %14, %cst_19 {dimension_numbers = #tpu.dot_dimension_numbers<[1], [0], [0], [1], [0, 0, 1, 1], [], []>} : vector<8x8xbf16>, vector<8x128xbf16>, vector<8x128xf32> -> vector<8x128xf32>
    %45 = arith.addf %42, %44 : vector<8x128xf32>
    %c0_20 = arith.constant 0 : index
    %c0_21 = arith.constant 0 : index
    %46 = vector.load %arg12[%c0_20, %c0_21] : memref<8x128xf32, #tpu.memory_space<vmem>>, vector<8x128xf32>
    tpu.vector_store %arg12[%c0_20, %c0_21], %45 {strides = array<i32>} : memref<8x128xf32, #tpu.memory_space<vmem>>, vector<8x128xf32>,
    %c0_22 = arith.constant 0 : index
    %c0_23 = arith.constant 0 : index
    %47 = vector.load %arg10[%c0_22, %c0_23] : memref<8x1xf32, #tpu.memory_space<vmem>>, vector<8x1xf32>
    tpu.vector_store %arg10[%c0_22, %c0_23], %28 {strides = array<i32>} : memref<8x1xf32, #tpu.memory_space<vmem>>, vector<8x1xf32>,
    %48 = arith.cmpi eq, %3, %1 : i32
    %49 = arith.extui %48 : i1 to i32
    %c0_i32_24 = arith.constant 0 : i32
    %50 = arith.cmpi ne, %49, %c0_i32_24 : i32
    scf.if %50 {
      %c0_25 = arith.constant 0 : index
      %c0_26 = arith.constant 0 : index
      %51 = vector.load %arg11[%c0_25, %c0_26] : memref<8x1xf32, #tpu.memory_space<vmem>>, vector<8x1xf32>
      %52 = tpu.reciprocal %51 {approx = true} : vector<8x1xf32> -> vector<8x1xf32>
      %c0_27 = arith.constant 0 : index
      %c0_28 = arith.constant 0 : index
      %53 = vector.load %arg12[%c0_27, %c0_28] : memref<8x128xf32, #tpu.memory_space<vmem>>, vector<8x128xf32>
      %54 = vector.broadcast %52 : vector<8x1xf32> to vector<8x128xf32>
      %55 = arith.mulf %53, %54 : vector<8x128xf32>
      %56 = arith.truncf %55 : vector<8x128xf32> to vector<8x128xbf16>
      %c0_29 = arith.constant 0 : index
      %c0_30 = arith.constant 0 : index
      %c0_31 = arith.constant 0 : index
      %57 = vector.load %arg8[%c0_29, %c0_30, %c0_31] : memref<1x8x128xbf16, #tpu.memory_space<vmem>>, vector<1x8x128xbf16>
      %58 = vector.shape_cast %57 : vector<1x8x128xbf16> to vector<8x128xbf16>
      %59 = vector.shape_cast %56 : vector<8x128xbf16> to vector<1x8x128xbf16>
      tpu.vector_store %arg8[%c0_29, %c0_30, %c0_31], %59 {strides = array<i32>} : memref<1x8x128xbf16, #tpu.memory_space<vmem>>, vector<1x8x128xbf16>,
    } else {
    }
    return
  }
  func.func @transform_0(%arg0: i32, %arg1: i32, %arg2: memref<1xi32, #tpu.memory_space<smem>>, %arg3: memref<1xi32, #tpu.memory_space<smem>>) -> (i32, i32, i32) {
    %0 = arith.index_cast %arg1 : i32 to index
    %1 = memref.load %arg2[%0] : memref<1xi32, #tpu.memory_space<smem>>
    %c0_i32 = arith.constant 0 : i32
    %c0_i32_0 = arith.constant 0 : i32
    return %arg0, %1, %c0_i32 : i32, i32, i32
  }
  func.func @transform_1(%arg0: i32, %arg1: i32, %arg2: memref<1xi32, #tpu.memory_space<smem>>, %arg3: memref<1xi32, #tpu.memory_space<smem>>) -> (i32, i32, i32) {
    %0 = arith.index_cast %arg1 : i32 to index
    %1 = memref.load %arg3[%0] : memref<1xi32, #tpu.memory_space<smem>>
    %c0_i32 = arith.constant 0 : i32
    %c0_i32_0 = arith.constant 0 : i32
    return %arg0, %1, %c0_i32 : i32, i32, i32
  }
  func.func @transform_2(%arg0: i32, %arg1: i32, %arg2: memref<1xi32, #tpu.memory_space<smem>>, %arg3: memref<1xi32, #tpu.memory_space<smem>>) -> (i32, i32) {
    %c0_i32 = arith.constant 0 : i32
    %c0_i32_0 = arith.constant 0 : i32
    %c0_i32_1 = arith.constant 0 : i32
    return %c0_i32, %c0_i32_0 : i32, i32
  }
  func.func @transform_3(%arg0: i32, %arg1: i32, %arg2: memref<1xi32, #tpu.memory_space<smem>>, %arg3: memref<1xi32, #tpu.memory_space<smem>>) -> (i32, i32) {
    %c0_i32 = arith.constant 0 : i32
    %c0_i32_0 = arith.constant 0 : i32
    %c0_i32_1 = arith.constant 0 : i32
    return %c0_i32, %c0_i32_0 : i32, i32
  }
  func.func @transform_4(%arg0: i32, %arg1: i32, %arg2: memref<1xi32, #tpu.memory_space<smem>>, %arg3: memref<1xi32, #tpu.memory_space<smem>>) -> (i32, i32, i32) {
    %0 = arith.index_cast %arg1 : i32 to index
    %1 = memref.load %arg2[%0] : memref<1xi32, #tpu.memory_space<smem>>
    %c0_i32 = arith.constant 0 : i32
    %c0_i32_0 = arith.constant 0 : i32
    return %arg0, %1, %c0_i32 : i32, i32, i32
  }
}

</mosaic_0001>

<bundles_post_ra>
// kernel: tpu_custom_call.1
= control target key start
LH: loop header
LB: loop body
LE: loop exit
PB: predicated region body
PF: predicated region fallthrough
CT: control target
= control target key end

     0   :  { %s1498_s0 = inlined_call_operand.<no memory space> [shape: s32[1], index: 0, kind: input, shape index: {}]   ;;  %s1499_s1 = inlined_call_operand.<no memory space> [shape: s32[1], index: 1, kind: input, shape index: {}]   ;;  %s1500_s2 = inlined_call_operand.hbm [shape: bf16[2,8,32], index: 2, kind: input, shape index: {}]   ;;  %s1501_s3 = inlined_call_operand.hbm [shape: bf16[2,8,32], index: 3, kind: input, shape index: {}]   ;;  %s1502_s4 = inlined_call_operand.hbm [shape: bf16[32,128], index: 4, kind: input, shape index: {}]   ;;  %s1503_s5 = inlined_call_operand.hbm [shape: bf16[32,256], index: 5, kind: input, shape index: {}]   ;;  %s1504_s6 = inlined_call_operand.hbm [shape: bf16[2,8,128], index: 6, kind: output, shape index: {}]  }
   0x1   :  { %1514 = sst [smem:[#allocation29_spill]] %s1502_s4 }
   0x2   :  { %1515 = sst [smem:[#allocation30_spill]] %s1503_s5 }
   0x3   :  { %1516 = sst [smem:[#allocation31_spill]] %s1504_s6 }
   0x4   :  { %11 = sst [smem:[#allocation7]] %s1498_s0 }
   0x5   :  { %12 = sst [smem:[#allocation8]] %s1499_s1 }
   0x6   :  { %13 = vsyncpa [#allocation10], 0 }
   0x7   :  { %15 = vsyncpa [#allocation10 + $0x1], 0 }
   0x8   :  { %16 = vsyncpa [#allocation13], 0 }
   0x9   :  { %18 = vsyncpa [#allocation13 + $0x1], 0 }
   0xa   :  { %19 = vsyncpa [#allocation16], 0 }
   0xb   :  { %20 = vsyncpa [#allocation11], 0 }
   0xc   :  { %22 = vsyncpa [#allocation11 + $0x1], 0  ;;  %s1187_s25 = smov 0   ;;  %s1189_s26 = smov 0  }
   0xd   :  { %s1191_s27 = smov 0   ;;  %s1193_s28 = smov 0  }
   0xe   :  { %s1195_s0 = smov 0   ;;  %s1197_s29 = smov 0  }
   0xf   :  { %s1199_s1 = smov 0   ;;  %s1201_s30 = smov 0  }
  0x10   :  { %s1203_s7 = smov 0   ;;  %s1205_s8 = smov 0  }
  0x11   :  { %s1207_s9 = smov 0   ;;  %s1209_s10 = smov 0  }
  0x12 LB: > { %1517 = sst [smem:[#allocation23_spill]] %s1090_s25  ;;  %s1248_s11 = sadd.s32 4294967295, %s1134_s10   ;;  %s1134_s10 = sphi %s1209_s10, %s28_s10   ;;  %s1130_s9 = sphi %s1207_s9, %s1560_s9   ;;  %s1126_s8 = sphi %s1205_s8, %s1559_s8   ;;  %s1122_s7 = sphi %s1203_s7, %s1558_s7   ;;  %s1118_s30 = sphi %s1201_s30, %s1557_s30   ;;  %s1114_s1 = sphi %s1199_s1, %s1556_s1   ;;  %s1110_s29 = sphi %s1197_s29, %s1555_s29   ;;  %s1106_s0 = sphi %s1195_s0, %s1554_s0   ;;  %s1102_s28 = sphi %s1193_s28, %s1553_s28   ;;  %s1098_s27 = sphi %s1191_s27, %s1552_s27   ;;  %s1094_s26 = sphi %s1189_s26, %s1551_s26   ;;  %s1090_s25 = sphi %s1187_s25, %s1548_s25  }
  0x13   : > { %1518 = sst [smem:[#allocation24_spill]] %s1094_s26  ;;  %p665_p0 = scmp.ge.s32.totalorder %s1134_s10, 1 }
  0x14   : > { %1519 = sst [smem:[#allocation25_spill]] %s1126_s8  ;;  %p1512_p1 = scmp.eq.s32.totalorder %s1248_s11, 0 }
  0x15   : > { %p164_p2 = scmp.eq.s32.totalorder %s1248_s11, 1  ;;  %p177_p3 = scmp.lt.s32.totalorder %s1134_s10, 3 }
  0x16   : > { %s1520_s4 = sld [smem:[#allocation29_spill]]  ;;  %s1136_s16 = smov [#allocation14]  }
  0x17   : > { %p1257_p4 = pnand %p665_p0, %p177_p3  ;;  %s190_s17 = sshll.u32 %s1136_s16, 4  ;;  %s191_s17 = int_to_ptr.vmem [resolvable:$true] %s190_s17 }
  0x18   : > { %s1522_s5 = sld [smem:[#allocation30_spill]]  ;;  %s1137_s21 = smov [#allocation15]  }
  0x19   : > { %p733_p5 = pneg %p1257_p4  ;;  %s204_s22 = sshll.u32 %s1137_s21, 4  ;;  %s205_s22 = int_to_ptr.vmem [resolvable:$true] %s204_s22 }
  0x1a   : > { %s1138_s23 = smov 64   ;;  %s1139_s24 = smov 4  }
  0x1b   : > { %p734_p7 = pnand %p733_p5, %p1512_p1  ;;  %s1140_s12 = smov 128  }
  0x1c   : > { %s188_s14 = sshll.u32 %s1520_s4, 4  ;;  %s1141_s13 = smov 8   ;;  %s189_s14 = int_to_ptr.hbm [resolvable:$true] %s188_s14 }
  0x1d   : > { %736 = dma.hbm_to_vmem [thread:$0]  (!%p734_p7), %s189_s14, 256, %s191_s17, [#allocation13], %s1138_s23, %s1138_s23, %s1139_s24  }
  0x1e   : > { %s202_s20 = sshll.u32 %s1522_s5, 4  ;;  %s664_s16 = sadd.s32 4294967294, %s1134_s10   ;;  %s203_s20 = int_to_ptr.hbm [resolvable:$true] %s202_s20 }
  0x1f   : > { %739 = dma.hbm_to_vmem [thread:$0]  (!%p734_p7), %s203_s20, 512, %s205_s22, [#allocation16], %s1140_s12, %s1140_s12, %s1141_s13  }
  0x20   : > { %s40_s18 = sadd.s32 1, %s1130_s9  ;;  %s44_s19 = sld [smem:[#allocation7]] }
  0x21   : > { %p42_p8 = scmp.ge.s32.totalorder %s40_s18, 2  ;;  %s51_s21 = sadd.s32 1, %s1122_s7 }
  0x22   : > { %p58_p9 = scmp.ne.s32.totalorder %s1122_s7, %s1118_s30  ;;  %p1513_p10 = scmp.eq.s32.totalorder %s1134_s10, 0 }
  0x23   : > { %s1562_s18 = smov (%p42_p8, %s40_s18), 0  ;;  %p64_p12 = scmp.ne.s32.totalorder %s1118_s30, %s1114_s1 }
  0x24   : > { %1523 = sst [smem:[#allocation26_spill]] %s1562_s18  ;;  %p1279_p11 = por %p1513_p10, %p58_p9 }
  0x25   : > { %s46_s17 = ssub.s32 %s1130_s9, %s1562_s18  ;;  %s1287_s20 = sld [smem:[#allocation8]] }
  0x26   : > { %p1291_p13 = por %p1512_p1, %p64_p12  ;;  %s153_s23 = sadd.s32 1, %s1098_s27 }
  0x27   : > { %p1296_p0 = scmp.eq.s32.totalorder %s46_s17, 0  ;;  %p163_p3 = scmp.ne.s32.totalorder %s1098_s27, %s1094_s26 }
  0x28   : > { %p169_p5 = scmp.ne.s32.totalorder %s1094_s26, %s1090_s25  ;;  %p170_p7 = scmp.eq.s32.totalorder %s664_s16, 1 }
  0x29   : > { %s1307_s1 = scalar_select %p1296_p0, %s1122_s7, %s51_s21  }
  0x2a   : > { %p1311_p8 = por %p164_p2, %p163_p3  ;;  %p1315_p9 = por %p170_p7, %p169_p5 }
  0x2b   : > { %1527 = sst [smem:[#allocation27_spill]] %s1307_s1  ;;  %p1511_p12 = scmp.lt.s32.totalorder %s1134_s10, 2 }
  0x2c   : > { %s1529_s13 = scalar_select %p1315_p9, 1, 0 }
  0x2d   : > { %s1323_s17 = scalar_select %p1296_p0, %s1098_s27, %s153_s23  }
  0x2e   : > { %1530 = sst [smem:[#allocation28_spill]] %s1529_s13  ;;  %s218_s4 = sand.u32 1, %s1122_s7  }
  0x2f   : > { %s226_s16 = sadd.s32 %s1130_s9, %s44_s19  ;;  %s669_s5 = sshll.u32 %s218_s4, 2 }
  0x30   : > { %s670_s18 = sshll.u32 %s226_s16, 2  ;;  %s222_s6 = scalar_lea.vmem [#allocation9], %s669_s5 }
  0x31   : > { %s228_s1 = scalar_lea.hbm %s1500_s2, %s670_s18  ;;  %s232_s8 = sshll.u32 %s222_s6, 4  ;;  %s233_s8 = int_to_ptr.vmem [resolvable:$true] %s232_s8 }
  0x32   : > { %s230_s26 = sshll.u32 %s228_s1, 4  ;;  %p1334_p2 = pnand %p1511_p12, %p1279_p11  ;;  %s231_s26 = int_to_ptr.hbm [resolvable:$true] %s230_s26 }
  0x33   : > { %s219_s23 = scalar_lea.sflag [#allocation10], %s218_s4  ;;  %s932_s19 = sshra.s32 %s231_s26, 4  ;;  %s933_s19 = int_to_ptr.hbm [resolvable:$true] %s932_s19 }
  0x34   : > { %s934_s16 = scalar_lea.hbm %s933_s19, 4  ;;  %p936_p5 = pneg %p1334_p2 }
  0x35   : > { %p935_p3 = scmp.ne.s32.totalorder %s933_s19, %s934_s16  ;;  %s939_s25 = scalar_lea.hbm %s1500_s2, 8 }
  0x36   : > { %p940_p11 = scmp.lt.s32.totalorder %s933_s19, %s1500_s2  ;;  %p941_p12 = scmp.lt.s32.totalorder %s939_s25, %s934_s16 }
  0x37   : > { %p937_p7 = pnand %p936_p5, %p935_p3 }
  0x38   : > { %p942_p1 = por %p941_p12, %p940_p11 }
  0x39   : > { %p938_p6 = pneg %p937_p7 }
  0x3b   : > { %p943_p10 = pnand %p942_p1, %p938_p6 }
  0x3d   : > { %946 = shalt.err (!%p943_p10)
}
  0x3e   : > { %743 = dma.hbm_to_vmem [thread:$0]  (!%p1334_p2), %s231_s26, 64, %s233_s8, %s219_s23  }
  0x3f   : > { %s81_s4 = sadd.s32 1, %s1110_s29  ;;  %p88_p1 = scmp.ne.s32.totalorder %s1110_s29, %s1106_s0 }
  0x40   : > { %s1352_s1 = scalar_select %p1296_p0, %s1110_s29, %s81_s4  }
  0x41   : > { %p94_p6 = scmp.ne.s32.totalorder %s1106_s0, %s1102_s28  ;;  %s239_s13 = sand.u32 1, %s1134_s10  }
  0x42   : > { %s241_s21 = sand.u32 1, %s1110_s29   ;;  %p1532_p10 = scmp.eq.s32.totalorder %s1134_s10, 0 }
  0x43   : > { %p1533_p3 = scmp.eq.s32.totalorder %s1248_s11, 0  ;;  %s671_s16 = sshll.u32 %s241_s21, 2 }
  0x44   : > { %p90_p12 = por %p88_p1, %p1532_p10  ;;  %s247_s5 = sadd.s32 %s1130_s9, %s1287_s20 }
  0x45   : > { %p1364_p5 = por %p94_p6, %p1533_p3  ;;  %s672_s6 = sshll.u32 %s247_s5, 2 }
  0x46   : > { %s243_s26 = scalar_lea.vmem [#allocation12], %s671_s16  ;;  %s249_s25 = scalar_lea.hbm %s1501_s3, %s672_s6 }
  0x47   : > { %s253_s8 = sshll.u32 %s243_s26, 4  ;;  %s251_s28 = sshll.u32 %s249_s25, 4  ;;  %s254_s8 = int_to_ptr.vmem [resolvable:$true] %s253_s8  ;;  %s252_s28 = int_to_ptr.hbm [resolvable:$true] %s251_s28 }
  0x48   : > { %p1535_p0 = scmp.lt.s32.totalorder %s1134_s10, 2  ;;  %s240_s14 = scalar_lea.sflag [#allocation13], %s239_s13 }
  0x49   : > { %s962_s4 = sshra.s32 %s252_s28, 4  ;;  %s969_s5 = scalar_lea.hbm %s1501_s3, 8  ;;  %s963_s4 = int_to_ptr.hbm [resolvable:$true] %s962_s4 }
  0x4a   : > { %p1375_p2 = pnand %p1535_p0, %p90_p12  ;;  %s964_s20 = scalar_lea.hbm %s963_s4, 4 }
  0x4b   : > { %p965_p7 = scmp.ne.s32.totalorder %s963_s4, %s964_s20  ;;  %p970_p10 = scmp.lt.s32.totalorder %s963_s4, %s1501_s3 }
  0x4c   : > { %p966_p11 = pneg %p1375_p2  ;;  %p971_p12 = scmp.lt.s32.totalorder %s969_s5, %s964_s20 }
  0x4e   : > { %p967_p1 = pnand %p966_p11, %p965_p7  ;;  %p972_p3 = por %p971_p12, %p970_p10 }
  0x50   : > { %p968_p6 = pneg %p967_p1 }
  0x52   : > { %p973_p0 = pnand %p972_p3, %p968_p6 }
  0x54   : > { %976 = shalt.err (!%p973_p0)
}
  0x55   : > { %746 = dma.hbm_to_vmem [thread:$0]  (!%p1375_p2), %s252_s28, 64, %s254_s8, %s240_s14  }
  0x56   : > { %262 = sbr.rel (%p1257_p4) target bundleno = 1075 (0x433), region = 36  ;;  %s264_s13 = sand.u32 (!%p1257_p4), 1, %s1118_s30  }
  0x57   : > { %s674_s24 = sshll.u32 (!%p1257_p4), %s264_s13, 2  ;;  %s265_s23 = scalar_lea.sflag (!%p1257_p4), [#allocation10], %s264_s13 }
  0x58   : > { %s268_s25 = scalar_lea.vmem (!%p1257_p4), [#allocation9], %s674_s24 }
  0x5b   : > { %1069 = dma.done.wait (%p1291_p13), %s265_s23, 64  }
  0x5c   : > { %1071 = vsyncadd (%p1291_p13), %s265_s23, 4294967232  ;;  %s274_s4 = sand.u32 1, %s1248_s11   ;;  %s276_s18 = sand.u32 1, %s1106_s0  }
  0x5d   : > { %s1398_s8 = sshll.u32 %s276_s18, 2  ;;  %s275_s15 = scalar_lea.sflag [#allocation13], %s274_s4 }
  0x5e   : > { %s278_s28 = scalar_lea.vmem [#allocation12], %s1398_s8 }
  0x5f   : > { %1073 = dma.done.wait (%p1364_p5), %s275_s15, 64  }
  0x60   : > { %1075 = vsyncadd (%p1364_p5), %s275_s15, 4294967232  ;;  %p1537_p4 = scmp.eq.s32.totalorder %s1248_s11, 0 }
  0x62   : > { %1077 = dma.done.wait (%p1537_p4), [#allocation13], 256   ;;  %p1538_p13 = pmov %p1537_p4 }
  0x63   : > { %p1539_p2 = pmov %p1537_p4 }
  0x64   : > { %1079 = vsyncadd (%p1538_p13), [#allocation13], 4294967040 }
  0x65   : > { %1081 = dma.done.wait (%p1539_p2), [#allocation16], 512   ;;  %p1540_p7 = pmov %p1539_p2 }
  0x66   : > { %s1541_s22 = sld [smem:[#allocation24_spill]] }
  0x67   : > { %1083 = vsyncadd (%p1540_p7), [#allocation16], 4294966784  ;;  %s1414_s20 = sld [smem:[#allocation7]] }
  0x68   : > { %s1420_s21 = sld [smem:[#allocation8]] }
  0x6c   : > { %s316_s14 = sand.u32 1, %s1541_s22  }
  0x6d   : > { %s1418_s19 = sshll.u32 %s316_s14, 2 }
  0x6e   : > { %s318_s16 = scalar_lea.vmem [#allocation17], %s1418_s19  ;;  %p679_p5 = scmp.ne.s32.totalorder %s1420_s21, 0 }
  0x70   : > { %328 = sbr.rel (%p679_p5) target bundleno = 259 (0x103), region = 56 }
  0x75   : > { %v714_v0 = vld [vmem:[#allocation14 + $0x8] sm:$0xff]  ;;  %v713_v1 = vld [vmem:[#allocation14] sm:$0xff]  ;;  %v329_v2 = vld [vmem:[%s268_s25] sm:$0xf]  ;;  %vm346_vm0 = vcmask 261120   ;;  %vm365_vm1 = vcmask 7168  }
  0x76   : > { %356 = vmatpush.bf16.msra.mxu0 %v714_v0  ;;  %v1142_v3 = vmov -1e+30   ;;  %v1143_v4 = vmov 0.0  }
  0x77   : > { %366 = vst.msk [vmem:[#allocation3] sm:$0xff] %vm365_vm1, %v1142_v3 }
  0x78   : > { %367 = vst.msk [vmem:[#allocation4] sm:$0xff] %vm365_vm1, %v1143_v4 }
  0x79   : > { %368 = vst [vmem:[#allocation5] sm:$0xff] %v1143_v4 }
  0x7a   : > { %357 = vmatpush.bf16.msra.mxu0 %v713_v1 }
  0x7d   : > { %688 = vmatmul.msk.bf16.vlgmr.msra.gmra.mxu0 %vm346_vm0, %v329_v2 }
  0xfa   : > { %v359_v5 = vpop.f32.mrf.mxu0 }
  0xfb   : > { %v363_v6 = vpack.c.bf16 %v359_v5, %v359_v5 }
  0xfd   : > { %364 = vst [vmem:[#allocation2] sm:$0xf] %v363_v6 }
 0x102   : > { %v361_v7 = vpop.f32.mrf.mxu0 }
 0x103 PF: > { %v699_v8 = vld [vmem:[#allocation15 + $0x10] sm:$0xf]  ;;  %v718_v9 = vld [vmem:[#allocation15 + $0x14] sm:$0xf0]  ;;  %v691_v10 = vld [vmem:[#allocation15] sm:$0xf]  ;;  %p444_p11 = scmp.lt.s32.totalorder %s1420_s21, %s1414_s20  ;;  %v440_v25 = vlaneseq  ;;  %p708_p1 = scmp.ne.s32.totalorder %s1420_s21, %s1414_s20 }
 0x104   : > { %v700_v11 = vor.u32 %v718_v9, %v699_v8  ;;  %v716_v12 = vld [vmem:[#allocation15 + $0x4] sm:$0xf0]  ;;  %vm394_vm2 = vcmask 261120   ;;  %v426_v17 = vld [vmem:[#allocation2] sm:$0xf]  ;;  %vm452_vm6 = vcmask 64512  }
 0x105   : > { %v692_v13 = vor.u32 %v716_v12, %v691_v10  ;;  %v369_v14 = vld [vmem:[%s278_s28] sm:$0xf]  ;;  %v717_v19 = vld [vmem:[#allocation15 + $0x14] sm:$0xf]  ;;  %v701_v20 = vld [vmem:[#allocation15 + $0x18] sm:$0xf0] }
 0x106   : > { %404 = vmatpush.bf16.msra.mxu0 %v700_v11  ;;  %v715_v21 = vld [vmem:[#allocation15 + $0x4] sm:$0xf]  ;;  %v704_v22 = vor.u32 %v717_v19, %v701_v20  ;;  %v693_v23 = vld [vmem:[#allocation15 + $0x8] sm:$0xf0]  ;;  %s446_s11 = scalar_select %p444_p11, 1, 0 }
 0x107   : > { %v696_v24 = vor.u32 %v715_v21, %v693_v23  ;;  %v441_v26 = vshrl.u32 %v440_v25, 7  ;;  %v443_v27 = vand.u32 127, %v440_v25  ;;  %v1144_v33 = vmov 0   ;;  %v451_v35 = vld [vmem:[#allocation3] sm:$0xff]  ;;  %v468_v51 = vld [vmem:[#allocation4] sm:$0xff]  ;;  %v476_v55 = vld [vmem:[#allocation5] sm:$0xff] }
 0x108   : > { %417 = vmatpush.bf16.msra.mxu1 %v704_v22  ;;  %v447_v28 = vstv %s446_s11  ;;  %863 = vset.pattern.permute.xlu0 %v1144_v33  ;;  %vm474_vm7 = vcmask 7168   ;;  %vm487_vm8 = vcmask 1043456  }
 0x109   : > { %vm445_vm3 = vcmp.le.s32.totalorder %v443_v27, %v441_v26  ;;  %vm448_vm4 = vcmp.eq.s32.totalorder %v447_v28, 1  ;;  %864 = vset.pattern.permute.xlu1 %v1144_v33 }
 0x10a   : > { %405 = vmatpush.bf16.msra.mxu0 %v692_v13  ;;  %vm449_vm5 = vmor %vm448_vm4, %vm445_vm3 }
 0x10c   : > { %418 = vmatpush.bf16.msra.mxu1 %v696_v24 }
 0x10d   : > { %705 = vmatmul.msk.bf16.vlgmr.msra.gmra.mxu0 %vm394_vm2, %v369_v14 }
 0x10f   : > { %706 = vmatmul.msk.bf16.vlgmr.msra.gmra.mxu1 %vm394_vm2, %v369_v14 }
 0x18a   : > { %v407_v15 = vpop.f32.mrf.mxu0 }
 0x18b   : > { %v424_v16 = vpack.c.bf16 %v407_v15, %v407_v15 }
 0x18c   : > { %v420_v34 = vpop.f32.mrf.mxu1 }
 0x18d   : > { %434 = vmatpush.bf16.xpose.msra.mxu2 %v424_v16  ;;  %v425_v42 = vpack.c.bf16 %v420_v34, %v420_v34 }
 0x18f   : > { %v489_v43 = vsel %vm487_vm8, %v425_v42, 0 }
 0x190   : > { %498 = vmatpush.bf16.msra.mxu3 %v489_v43 }
 0x192   : > { %v409_v18 = vpop.f32.mrf.mxu0 }
 0x194   : > { %435 = vmatmul.bf16.vlgmr.msra.gmra.mxu2 %v426_v17  ;;  %v422_v38 = vpop.f32.mrf.mxu1 }
 0x217   : > { %v436_v29 = vpop.f32.mrf.mxu2 }
 0x218   : > { %v450_v30 = vsel %vm449_vm5, %v436_v29, -1e+30 }
 0x219   : > { %v453_v31 = vsel %vm452_vm6, %v450_v30, -inf }
 0x21a   : > { %454 = vmax.xlane.f32.xlu0 %v453_v31 }
 0x21f   : > { %v438_v32 = vpop.f32.mrf.mxu2 }
 0x28d   : > { %v455_v36 = vpop.xlane.xlu0 %454 }
 0x28e   : > { %v456_v37 = vmax.f32 %v451_v35, %v455_v36 }
 0x290   : > { %v457_v39 = vsub.f32 %v451_v35, %v456_v37  ;;  %506 = vst.msk [vmem:[#allocation3] sm:$0xff] %vm474_vm7, %v456_v37  ;;  %462 = vperm.xlu0 %863, %v456_v37  }
 0x292   : > { %v458_v40 = vmul.f32 1.442695, %v457_v39 }
 0x294   : > { %865 = vpow2.f32 %v458_v40 }
 0x29a   : > { %v866_v41 = vpop.eup %865 }
 0x29b   : > { %479 = vperm.xlu1 %864, %v866_v41   ;;  %v469_v52 = vmul.f32 %v866_v41, %v468_v51 }
 0x302   : > { %v463_v44 = vpop.permute.xlu0 %462 }
 0x303   : > { %v465_v45 = vsub.f32 %v450_v30, %v463_v44 }
 0x305   : > { %v466_v46 = vmul.f32 1.442695, %v465_v45 }
 0x307   : > { %867 = vpow2.f32 %v466_v46 }
 0x30d   : > { %v868_v47 = vpop.eup %867  ;;  %v480_v50 = vpop.permute.xlu1 %479 }
 0x30e   : > { %v470_v48 = vsel %vm452_vm6, %v868_v47, 0.0  ;;  %v483_v49 = vpack.c.bf16 %v868_v47, %v868_v47  ;;  %v482_v56 = vmul.f32 %v480_v50, %v476_v55 }
 0x30f   : > { %471 = vadd.xlane.f32.xlu1 %v470_v48 }
 0x310   : > { %707 = vmatmul.msk.bf16.vlgmr.msra.gmra.mxu3 %vm452_vm6, %v483_v49 }
 0x382   : > { %v472_v53 = vpop.xlane.xlu1 %471 }
 0x383   : > { %v473_v54 = vadd.f32 %v472_v53, %v469_v52 }
 0x385   : > { %475 = vst.msk [vmem:[#allocation4] sm:$0xff] %vm474_vm7, %v473_v54 }
 0x393   : > { %v500_v57 = vpop.f32.mrf.mxu3 }
 0x394   : > { %v504_v58 = vadd.f32 %v500_v57, %v482_v56 }
 0x396   : > { %505 = vst [vmem:[#allocation5] sm:$0xff] %v504_v58 }
 0x397   : > { %510 = sbr.rel (%p708_p1) target bundleno = 1052 (0x41c), region = 60 }
 0x39b   : > { %v502_v59 = vpop.f32.mrf.mxu3 }
 0x39c   : > { %v511_v60 = vld [vmem:[#allocation4] sm:$0xff]  ;;  %v1145_v61 = vmov 0  }
 0x39d   : > { %869 = vset.pattern.permute.xlu0 %v1145_v61  ;;  %870 = vrcp.f32 %v511_v60  ;;  %v513_v63 = vld [vmem:[#allocation5] sm:$0xff] }
 0x3a3   : > { %v871_v62 = vpop.eup %870 }
 0x3a4   : > { %516 = vperm.xlu0 %869, %v871_v62  }
 0x416   : > { %v517_v0 = vpop.permute.xlu0 %516 }
 0x417   : > { %v519_v1 = vmul.f32 %v517_v0, %v513_v63 }
 0x419   : > { %v520_v2 = vpack.c.bf16 %v519_v1, %v519_v1 }
 0x41b   : > { %521 = vst [vmem:[%s318_s16] sm:$0xf] %v520_v2 }
 0x41c PF: > { %s530_s5 = sld [smem:[#allocation7]]  ;;  %s537_s13 = sshll.u32 %s318_s16, 4  ;;  %s538_s13 = int_to_ptr.vmem [resolvable:$true] %s537_s13 }
 0x41d   : > { %s1542_s6 = sld [smem:[#allocation25_spill]]  ;;  %s523_s28 = scalar_lea.sflag [#allocation11], %s316_s14 }
 0x41e   : > { %s1544_s18 = sld [smem:[#allocation31_spill]] }
 0x423   : > { %s533_s24 = sadd.s32 %s1542_s6, %s530_s5 }
 0x424   : > { %s710_s23 = sshll.u32 %s533_s24, 2  ;;  %s1012_s16 = scalar_lea.hbm %s1544_s18, 8 }
 0x425   : > { %s535_s8 = scalar_lea.hbm %s1544_s18, %s710_s23 }
 0x426   : > { %s539_s15 = sshll.u32 %s535_s8, 4  ;;  %s540_s15 = int_to_ptr.hbm [resolvable:$true] %s539_s15 }
 0x427   : > { %s1006_s22 = sshra.s32 %s540_s15, 4  ;;  %s1007_s22 = int_to_ptr.hbm [resolvable:$true] %s1006_s22 }
 0x428   : > { %s1008_s20 = scalar_lea.hbm %s1007_s22, 4  ;;  %p1013_p3 = scmp.lt.s32.totalorder %s1007_s22, %s1544_s18 }
 0x429   : > { %p1009_p6 = scmp.ne.s32.totalorder %s1007_s22, %s1008_s20  ;;  %p1014_p0 = scmp.lt.s32.totalorder %s1012_s16, %s1008_s20 }
 0x42b   : > { %p1010_p10 = pnand %p1009_p6, %p1311_p8  ;;  %p1015_p4 = por %p1014_p0, %p1013_p3 }
 0x42d   : > { %p1011_p12 = pneg %p1010_p10 }
 0x42f   : > { %p1016_p13 = pnand %p1015_p4, %p1011_p12 }
 0x431   : > { %1019 = shalt.err (!%p1016_p13)
}
 0x432   : > { %731 = dma.vmem_to_hbm [thread:$0]  (%p1311_p8), %s538_s13, 64, %s540_s15, %s523_s28  }
 0x433 PF: > { %s1545_s14 = sld [smem:[#allocation23_spill]]  ;;  %p1547_p2 = scmp.ge.s32.totalorder %s1134_s10, 2 }
 0x435   : > { %p748_p7 = pnand %p1547_p2, %p1315_p9 }
 0x437   : > { %p749_p5 = pneg %p748_p7 }
 0x439   : > { %s551_s26 = sand.u32 1, %s1545_s14  }
 0x43a   : > { %s552_s24 = scalar_lea.sflag [#allocation11], %s551_s26 }
 0x43b   : > { %1085 = dma.done.wait (%p749_p5), %s552_s24, 64  }
 0x43c   : > { %1087 = vsyncadd (%p749_p5), %s552_s24, 4294967232  ;;  %s28_s10 = sadd.s32 1, %s1134_s10   ;;  %s1548_s25 = sld [smem:[#allocation24_spill]] }
 0x43d   : > { %p25_p11 = scmp.ge.s32.totalorder %s28_s10, 4   ;;  %s1549_s12 = sld [smem:[#allocation27_spill]] }
 0x43e   : > { %s1550_s13 = sld [smem:[#allocation26_spill]]  ;;  %s1551_s26 = smov %s1098_s27 }
 0x43f   : > { %s1552_s27 = smov %s1323_s17  ;;  %s1553_s28 = smov %s1106_s0 }
 0x440   : > { %s1554_s0 = smov %s1110_s29  ;;  %s1555_s29 = smov %s1352_s1 }
 0x441   : > { %s1556_s1 = smov %s1118_s30  ;;  %s1557_s30 = smov %s1122_s7 }
 0x442   : > { %s1559_s8 = smov %s1130_s9  ;;  %27 = sbr.rel (!%p25_p11) target bundleno = 18 (0x12), region = 110 }
 0x443   : > { %s1558_s7 = smov %s1549_s12 }
 0x444   : > { %s1560_s9 = smov %s1550_s13 }
 0x447   :  { %558 = vsyncpa [#allocation10], 1 }
 0x448   :  { %560 = vsyncpa [#allocation10 + $0x1], 1 }
 0x449   :  { %561 = vsyncpa [#allocation13], 1 }
 0x44a   :  { %563 = vsyncpa [#allocation13 + $0x1], 1 }
 0x44b   :  { %564 = vsyncpa [#allocation16], 1 }
 0x44c   :  { %565 = vsyncpa [#allocation11], 1 }
 0x44d   :  { %567 = vsyncpa [#allocation11 + $0x1], 1 }

</bundles_post_ra>
